<compile_context>
chip_gen: v5e
topology: v5e:2x2
jax: 0.10.0
libtpu: 0.0.40
codegen_flags: <defaults>
</compile_context>

<pallas_src>
import jax
import jax.numpy as jnp
from jax.experimental import pallas as pl
from jax.experimental.pallas import tpu as pltpu


# ----------------------------------------------------------------------------
# Fast path: 4-D (0, 2, 3, 1)  ==  NCHW -> NHWC
# ----------------------------------------------------------------------------

def _nchw_to_nhwc_kernel(x_ref, o_ref):
    # x_ref: (C, TH, W)  -- one batch element, one H tile (batch dim squeezed)
    # o_ref: (TH, W*C)   -- lane-dense output slab
    c, th, w = x_ref.shape
    # Minor transpose on the tile (XLU). Row-preserving reshape collapses the
    # trailing (W, C) pair into one lane-dense dim.  (pltpu.einshape("chw->hwc")
    # is an alternative; jnp.transpose lowers fine here.)
    t = jnp.transpose(x_ref[...], (1, 2, 0))          # (TH, W, C)
    o_ref[...] = t.reshape(th, w * c)                 # (TH, W*C)


def _pick_h_tile(H, row_bytes, budget_bytes):
    """Largest H tile whose double-buffered in+out footprint fits the budget.

    Per grid step the pipeline holds ~2x input tile + 2x output tile, each of
    size TH * row_bytes.  Keep the sublane (second-to-last) dim a multiple of
    8, or equal to the full H (always layout-legal).
    """
    max_th = max(1, budget_bytes // (4 * row_bytes))
    if H <= max_th:
        return H                      # full dim: always legal, biggest DMAs
    if max_th < 8:
        return min(8, H)              # keep sublane dim layout-legal
    th = 8
    for cand in range(8, max_th + 1, 8):
        if H % cand == 0:
            th = cand                 # prefer tiles that divide H evenly
    return th


def _permute_nchw_to_nhwc(x):
    B, C, H, W = x.shape
    itemsize = jnp.dtype(x.dtype).itemsize
    row_bytes = W * C * itemsize
    # ~24 MiB total live tile bytes: fits v7x's 32 MiB scoped-VMEM default
    # with headroom; on v5e/v6e (128 MiB) this still gives large DMAs.
    TH = _pick_h_tile(H, row_bytes, budget_bytes=24 * 1024 * 1024)
    h_tiles = pl.cdiv(H, TH)

    out_flat = pl.pallas_call(
        _nchw_to_nhwc_kernel,
        out_shape=jax.ShapeDtypeStruct((B, H, W * C), x.dtype),
        grid_spec=pltpu.PrefetchScalarGridSpec(
            num_scalar_prefetch=0,
            grid=(B, h_tiles),
            in_specs=[pl.BlockSpec(
                (pl.Squeezed(), C, TH, W),
                lambda b, h: (b, 0, h, 0))],
            out_specs=pl.BlockSpec(
                (pl.Squeezed(), TH, W * C),
                lambda b, h: (b, h, 0)),
        ),
        compiler_params=pltpu.CompilerParams(
            dimension_semantics=("parallel", "parallel"),
            vmem_limit_bytes=32 * 1024 * 1024,
        ),
        cost_estimate=pl.CostEstimate(
            flops=0, transcendentals=0,
            bytes_accessed=2 * x.size * itemsize),
    )(x)

    # Free metadata-only reshape back to NHWC.
    return out_flat.reshape(B, H, W, C)


# ----------------------------------------------------------------------------
# General fallback for arbitrary permutations
# ----------------------------------------------------------------------------

def _make_general_kernel(perm):
    def kernel(x_ref, o_ref):
        o_ref[...] = jnp.transpose(x_ref[...], perm)
    return kernel


def _permute_general(x, perm):
    out_shape = tuple(x.shape[p] for p in perm)
    itemsize = jnp.dtype(x.dtype).itemsize
    cost = pl.CostEstimate(flops=0, transcendentals=0,
                           bytes_accessed=2 * x.size * itemsize)

    if x.ndim >= 2 and perm[0] == 0:
        # Grid over the (kept) leading axis; inner transpose in-kernel.
        inner_perm = tuple(p - 1 for p in perm[1:])
        n_in = x.ndim - 1
        n_out = len(out_shape) - 1
        return pl.pallas_call(
            _make_general_kernel(inner_perm),
            out_shape=jax.ShapeDtypeStruct(out_shape, x.dtype),
            grid_spec=pltpu.PrefetchScalarGridSpec(
                num_scalar_prefetch=0,
                grid=(x.shape[0],),
                in_specs=[pl.BlockSpec((pl.Squeezed(),) + tuple(x.shape[1:]),
                                       lambda b: (b,) + (0,) * n_in)],
                out_specs=pl.BlockSpec((pl.Squeezed(),) + tuple(out_shape[1:]),
                                       lambda b: (b,) + (0,) * n_out),
            ),
            compiler_params=pltpu.CompilerParams(
                dimension_semantics=("parallel",)),
            cost_estimate=cost,
        )(x)

    # Whole-tensor single-block fallback (permutation moves axis 0).
    # TODO(synk): tile this path too if such permutations show up at scale.
    return pl.pallas_call(
        _make_general_kernel(perm),
        out_shape=jax.ShapeDtypeStruct(out_shape, x.dtype),
        cost_estimate=cost,
    )(x)


# ----------------------------------------------------------------------------
# Public API
# ----------------------------------------------------------------------------

def pallas_permute(x, permutation):
    perm = tuple(int(p) for p in permutation)
    assert sorted(perm) == list(range(x.ndim)), "invalid permutation"
    if perm == tuple(range(x.ndim)):
        return x                                   # identity permutation
    if x.ndim == 4 and perm == (0, 2, 3, 1):
        return _permute_nchw_to_nhwc(x)            # optimized fast path
    return _permute_general(x, perm)


class Transpose:
    """JAX/Pallas port of the PyTorch Transpose module."""

    def __init__(self, permutation):
        self.permutation = tuple(permutation)

    def __call__(self, x):
        return pallas_permute(x, self.permutation)


if __name__ == "__main__":
    key = jax.random.PRNGKey(0)
    # Small NCHW input: batch=2, channels=4, spatial=16x16
    x = jax.random.normal(key, (2, 4, 16, 16), dtype=jnp.float32)

    perm = (0, 2, 3, 1)  # NCHW -> NHWC
    mod = Transpose(perm)
    y = jax.block_until_ready(mod(x))

    ref = jnp.transpose(x, perm)
    assert y.shape == ref.shape == (2, 16, 16, 4), (y.shape, ref.shape)
    assert jnp.array_equal(y, ref), "Pallas permute mismatch vs reference"
    print("KERNEL_OK")
</pallas_src>

<mosaic_0001>
module attributes {stable_mosaic.version = 11 : i64} {
  func.func @_nchw_to_nhwc_kernel(%arg0: i32, %arg1: i32, %arg2: memref<1x4x16x16xf32, #tpu.memory_space<vmem>>, %arg3: memref<1x16x64xf32, #tpu.memory_space<vmem>>) attributes {dimension_semantics = [#tpu.dimension_semantics<parallel>, #tpu.dimension_semantics<parallel>], iteration_bounds = array<i64: 2, 1>, scalar_prefetch = 0 : i64, scratch_operands = 0 : i64, tpu.core_type = #tpu.core_type<tc>, window_params = [{transform_indices = @transform_0, window_bounds = array<i64: 1, 4, 16, 16>}, {transform_indices = @transform_1, window_bounds = array<i64: 1, 16, 64>}]} {
    %c0 = arith.constant 0 : index
    %c0_0 = arith.constant 0 : index
    %c0_1 = arith.constant 0 : index
    %c0_2 = arith.constant 0 : index
    %0 = vector.load %arg2[%c0, %c0_0, %c0_1, %c0_2] : memref<1x4x16x16xf32, #tpu.memory_space<vmem>>, vector<1x4x16x16xf32>
    %1 = vector.shape_cast %0 : vector<1x4x16x16xf32> to vector<4x16x16xf32>
    %2 = tpu.transpose %1, [1, 2, 0] : vector<4x16x16xf32> -> vector<16x16x4xf32>
    %3 = vector.shape_cast %2 : vector<16x16x4xf32> to vector<16x64xf32>
    %c0_3 = arith.constant 0 : index
    %c0_4 = arith.constant 0 : index
    %c0_5 = arith.constant 0 : index
    %4 = vector.load %arg3[%c0_3, %c0_4, %c0_5] : memref<1x16x64xf32, #tpu.memory_space<vmem>>, vector<1x16x64xf32>
    %5 = vector.shape_cast %4 : vector<1x16x64xf32> to vector<16x64xf32>
    %6 = vector.shape_cast %3 : vector<16x64xf32> to vector<1x16x64xf32>
    tpu.vector_store %arg3[%c0_3, %c0_4, %c0_5], %6 {strides = array<i32>} : memref<1x16x64xf32, #tpu.memory_space<vmem>>, vector<1x16x64xf32>,
    return
  }
  func.func @transform_0(%arg0: i32, %arg1: i32) -> (i32, i32, i32, i32) {
    %c0_i32 = arith.constant 0 : i32
    %c0_i32_0 = arith.constant 0 : i32
    %c0_i32_1 = arith.constant 0 : i32
    return %arg0, %c0_i32, %arg1, %c0_i32_0 : i32, i32, i32, i32
  }
  func.func @transform_1(%arg0: i32, %arg1: i32) -> (i32, i32, i32) {
    %c0_i32 = arith.constant 0 : i32
    %c0_i32_0 = arith.constant 0 : i32
    return %arg0, %arg1, %c0_i32 : i32, i32, i32
  }
}

</mosaic_0001>

<bundles_post_ra>
// kernel: tpu_custom_call.1
= control target key start
LH: loop header
LB: loop body
LE: loop exit
PB: predicated region body
PF: predicated region fallthrough
CT: control target
= control target key end

     0   :  { %6 = vsyncpa [#allocation3], 0  ;;  %s3233_s0 = inlined_call_operand.hbm [shape: f32[2,4,16,16], index: 0, kind: input, shape index: {}]   ;;  %s3234_s1 = inlined_call_operand.hbm [shape: f32[2,16,64], index: 1, kind: output, shape index: {}]  }
   0x1   :  { %8 = vsyncpa [#allocation3 + $0x1], 0 }
   0x2   :  { %9 = vsyncpa [#allocation4], 0 }
   0x3   :  { %11 = vsyncpa [#allocation4 + $0x1], 0  ;;  %s2331_s6 = smov 0   ;;  %s2333_s7 = smov 0  }
   0x4   :  { %s2335_s8 = smov 0   ;;  %s2337_s9 = smov 0  }
   0x5   :  { %s2339_s10 = smov 0   ;;  %s2341_s11 = smov 0  }
   0x6 LB: > { %s2087_s12 = sadd.s32 4294967295, %s2299_s11   ;;  %s2088_s13 = sadd.s32 4294967294, %s2299_s11   ;;  %s2299_s11 = sphi %s2341_s11, %s17_s11   ;;  %s2295_s10 = sphi %s2339_s10, %s3243_s10   ;;  %s2291_s9 = sphi %s2337_s9, %s3242_s9   ;;  %s2287_s8 = sphi %s2335_s8, %s3241_s8   ;;  %s2283_s7 = sphi %s2333_s7, %s3240_s7   ;;  %s2279_s6 = sphi %s2331_s6, %s3239_s6  }
   0x7   : > { %s29_s14 = sadd.s32 1, %s2295_s10  ;;  %s38_s15 = sadd.s32 1, %s2287_s8 }
   0x8   : > { %p31_p0 = scmp.ge.s32.totalorder %s29_s14, 2  ;;  %p45_p1 = scmp.ne.s32.totalorder %s2287_s8, %s2283_s7 }
   0x9   : > { %p46_p2 = scmp.eq.s32.totalorder %s2299_s11, 0  ;;  %p51_p3 = scmp.ne.s32.totalorder %s2283_s7, %s2279_s6 }
   0xa   : > { %s3245_s14 = smov (%p31_p0, %s29_s14), 0  ;;  %p52_p5 = scmp.eq.s32.totalorder %s2087_s12, 0 }
   0xb   : > { %p2372_p4 = por %p46_p2, %p45_p1  ;;  %s33_s17 = ssub.s32 %s2295_s10, %s3245_s14 }
   0xc   : > { %p77_p6 = scmp.eq.s32.totalorder %s2087_s12, 1  ;;  %p36_p7 = scmp.eq.s32.totalorder %s33_s17, 0 }
   0xd   : > { %p2378_p8 = por %p52_p5, %p51_p3  ;;  %p83_p10 = scmp.eq.s32.totalorder %s2088_s13, 1 }
   0xe   : > { %p2382_p9 = por %p77_p6, %p45_p1  ;;  %p2090_p12 = scmp.ge.s32.totalorder %s2299_s11, 2 }
   0xf   : > { %s2387_s20 = scalar_select %p36_p7, %s2287_s8, %s38_s15  }
  0x10   : > { %p2389_p11 = por %p83_p10, %p51_p3  ;;  %p2116_p13 = scmp.lt.s32.totalorder %s2299_s11, 2 }
  0x11   : > { %s103_s22 = sand.u32 1, %s2287_s8   ;;  %s2102_s24 = sshll.u32 %s2295_s10, 6 }
  0x12   : > { %s2091_s23 = sshll.u32 %s103_s22, 6  ;;  %s114_s27 = scalar_lea.hbm %s3233_s0, %s2102_s24 }
  0x13   : > { %s107_s28 = scalar_lea.vmem [#allocation2], %s2091_s23  ;;  %s115_s30 = sshll.u32 %s114_s27, 4  ;;  %s116_s30 = int_to_ptr.hbm [resolvable:$true] %s115_s30 }
  0x14   : > { %s117_s29 = sshll.u32 %s107_s28, 4  ;;  %p2109_p0 = pnand %p2116_p13, %p2372_p4  ;;  %s118_s29 = int_to_ptr.vmem [resolvable:$true] %s117_s29 }
  0x15   : > { %p2094_p1 = scmp.ge.s32.totalorder %s2299_s11, 1  ;;  %s104_s2 = scalar_lea.sflag [#allocation3], %s103_s22 }
  0x16   : > { %s2301_s3 = smov 128   ;;  %s2302_s4 = smov 8  }
  0x17   : > { %2111 = dma.hbm_to_vmem [thread:$0]  (!%p2109_p0), %s116_s30, 1024, %s118_s29, %s104_s2, %s2301_s3, %s2301_s3, %s2302_s4  }
  0x18   : > { %p125_p2 = scmp.lt.s32.totalorder %s2299_s11, 3 }
  0x1a   : > { %p126_p3 = pnand %p2094_p1, %p125_p2 }
  0x1b   : > { %s2405_s5 = sand.u32 (!%p126_p3), 1, %s2283_s7  }
  0x1c   : > { %129 = sbr.rel (%p126_p3) target bundleno = 676 (0x2a4), region = 24  ;;  %s2095_s12 = sshll.u32 (!%p126_p3), %s2405_s5, 6 }
  0x1d   : > { %s132_s13 = scalar_lea.sflag (!%p126_p3), [#allocation3], %s2405_s5  ;;  %s135_s15 = scalar_lea.vmem (!%p126_p3), [#allocation2], %s2095_s12 }
  0x21   : > { %2270 = dma.done.wait (%p2378_p8), %s132_s13, 1024  }
  0x22   : > { %2272 = vsyncadd (%p2378_p8), %s132_s13, 4294966272  ;;  %v157_v0 = vld [vmem:[%s135_s15] sm:$0xff]  ;;  %v159_v2 = vld [vmem:[%s135_s15 + $0x10] sm:$0xff]  ;;  %v2303_v12 = vmov 1983009808   ;;  %vm294_vm0 = vcmask 1047556  }
  0x23   : > { %v161_v1 = vld [vmem:[%s135_s15 + $0x20] sm:$0xff]  ;;  %165 = vxpose.xlu0.b32.start [1/2] (short) (narrow) %v157_v0, 16  ;;  %197 = vxpose.xlu1.b32.start [1/2] (short) (narrow) %v159_v2, 16  ;;  %v158_v3 = vld [vmem:[%s135_s15 + $0x8] sm:$0xff]  ;;  %v160_v5 = vld [vmem:[%s135_s15 + $0x18] sm:$0xff]  ;;  %v299_v13 = vunpack.c.l.s4 %v2303_v12  ;;  %s2305_s16 = smov 8  }
  0x24   : > { %229 = vxpose.xlu2.b32.start [1/2] (short) (narrow) %v161_v1, 16  ;;  %v162_v4 = vld [vmem:[%s135_s15 + $0x28] sm:$0xff]  ;;  %v163_v6 = vld [vmem:[%s135_s15 + $0x30] sm:$0xff]  ;;  %v164_v7 = vld [vmem:[%s135_s15 + $0x38] sm:$0xff]  ;;  %v2304_v22 = vmov 1934713408  }
  0x25   : > { %v2415_v17 = vunpack.c.0.s8 %v299_v13  ;;  %v323_v23 = vunpack.c.l.s4 %v2304_v22  ;;  %s2306_s17 = smov 4   ;;  %s2307_s18 = smov 12   ;;  %vm1934_vm1 = vcmask 31744   ;;  %vm1937_vm2 = vcmask 64512  }
  0x26   : > { %s2308_s22 = smov 16   ;;  %s2309_s23 = smov 20   ;;  %vm1940_vm3 = vcmask 97280   ;;  %vm1943_vm4 = vcmask 130048   ;;  %vm1946_vm5 = vcmask 162816   ;;  %vm1949_vm6 = vcmask 195584  }
  0x27   : > { %v2424_v30 = vunpack.c.0.s8 %v323_v23  ;;  %s2310_s24 = smov 28   ;;  %s2311_s25 = smov 24   ;;  %vm1952_vm7 = vcmask 228352   ;;  %vm1955_vm8 = vcmask 261120   ;;  %vm1958_vm9 = vcmask 293888  }
  0x28   : > { %s2312_s26 = smov 36   ;;  %s2313_s27 = smov 32   ;;  %vm1961_vm10 = vcmask 326656   ;;  %vm1964_vm11 = vcmask 359424   ;;  %vm1967_vm12 = vcmask 392192   ;;  %vm1970_vm13 = vcmask 424960  }
  0x29   : > { %s2314_s28 = smov 40   ;;  %s2315_s29 = smov 48   ;;  %vm1973_vm14 = vcmask 457728   ;;  %vm1976_vm15 = vcmask 490496  }
  0x2a   : > { %s2316_s30 = smov 44   ;;  %s2317_s2 = smov 52  }
  0x2b   : > { %166 = vxpose.xlu0.b32.end [2/2] (short) (narrow) %v158_v3, 16  ;;  %198 = vxpose.xlu1.b32.end [2/2] (short) (narrow) %v160_v5, 16  ;;  %s2318_s3 = smov 60   ;;  %s2319_s4 = smov 56  }
  0x2c   : > { %230 = vxpose.xlu2.b32.end [2/2] (short) (narrow) %v162_v4, 16  ;;  %s2096_s12 = sshll.u32 %s2405_s5, 4  ;;  %s2103_s13 = sshll.u32 %s2291_s9, 4 }
  0x33   : > { %261 = vxpose.xlu0.b32.start [1/2] (short) (narrow) %v163_v6, 16 }
  0x3b   : > { %262 = vxpose.xlu0.b32.end [2/2] (short) (narrow) %v164_v7, 16 }
  0xbd   : > { %v245_v11 = vpop.trf.xlu2 }
  0xbe   : > { %v293_v16 = vrot.slane %v245_v11, 4 }
  0xc5   : > { %v246_v45 = vpop.trf.xlu2 }
  0xc6   : > { %v350_v50 = vrot.slane %v246_v45, 4 }
  0xc7   : > { %v181_v8 = vpop.trf.xlu0  ;;  %v213_v10 = vpop.trf.xlu1 }
  0xc8   : > { %v296_v14 = vrot.slane %v181_v8, 4  ;;  %v308_v15 = vrot.slane %v213_v10, 4  ;;  %v295_v25 = vsel %vm294_vm0, %v293_v16, %v181_v8 }
  0xc9   : > { %v301_v31 = vperm.slane %v295_v25, %v2415_v17 }
  0xca   : > { %v297_v19 = vsel %vm294_vm0, %v245_v11, %v296_v14 }
  0xcb   : > { %v305_v29 = vperm.slane %v297_v19, %v2415_v17  ;;  %v320_v39 = vrot.slane %v301_v31, 4 }
  0xcd   : > { %v332_v55 = vrot.slane %v305_v29, 4 }
  0xcf   : > { %v2413_v9 = vpop.trf.xlu0  ;;  %v214_v46 = vpop.trf.xlu1 }
  0xd0   : > { %v351_v53 = vsel %vm294_vm0, %v350_v50, %v2413_v9  ;;  %v364_v60 = vrot.slane %v214_v46, 4  ;;  %v352_v1 = vrot.slane %v2413_v9, 4 }
  0xd1   : > { %v357_v56 = vperm.slane %v351_v53, %v2415_v17 }
  0xd2   : > { %v353_v6 = vsel %vm294_vm0, %v246_v45, %v352_v1 }
  0xd3   : > { %v376_v63 = vrot.slane %v357_v56, 4 }
  0xd7   : > { %v277_v18 = vpop.trf.xlu0 }
  0xd8   : > { %v306_v20 = vrot.slane %v277_v18, 4  ;;  %v309_v21 = vsel %vm294_vm0, %v277_v18, %v308_v15 }
  0xd9   : > { %v317_v24 = vperm.slane %v309_v21, %v2415_v17 }
  0xda   : > { %v307_v26 = vsel %vm294_vm0, %v306_v20, %v213_v10  ;;  %v361_v10 = vperm.slane %v353_v6, %v2415_v17 }
  0xdb   : > { %v313_v27 = vperm.slane %v307_v26, %v2415_v17  ;;  %v330_v28 = vrot.slane %v317_v24, 4  ;;  %v333_v57 = vsel %vm294_vm0, %v317_v24, %v332_v55 }
  0xdc   : > { %v341_v59 = vperm.slane %v333_v57, %v2424_v30  ;;  %v388_v13 = vrot.slane %v361_v10, 4 }
  0xdd   : > { %v331_v32 = vsel %vm294_vm0, %v330_v28, %v305_v29  ;;  %v318_v33 = vrot.slane %v313_v27, 4  ;;  %v321_v41 = vsel %vm294_vm0, %v313_v27, %v320_v39 }
  0xde   : > { %v337_v34 = vperm.slane %v331_v32, %v2424_v30  ;;  %v329_v44 = vperm.slane %v321_v41, %v2424_v30  ;;  %v348_v62 = vrot.slane %v341_v59, 4 }
  0xdf   : > { %v319_v35 = vsel %vm294_vm0, %v318_v33, %v301_v31  ;;  %v278_v40 = vpop.trf.xlu0 }
  0xe0   : > { %534 = vxpose.xlu0.b32.start.end [1/1] (short) (narrow) %v337_v34, 16  ;;  %v325_v36 = vperm.slane %v319_v35, %v2424_v30  ;;  %v346_v42 = vrot.slane %v337_v34, 4  ;;  %v362_v43 = vrot.slane %v278_v40, 4  ;;  %v344_v49 = vrot.slane %v329_v44, 4 }
  0xe1   : > { %v365_v0 = vsel %vm294_vm0, %v278_v40, %v364_v60  ;;  %v349_v2 = vsel %vm294_vm0, 0.0, %v348_v62 }
  0xe2   : > { %406 = vxpose.xlu1.b32.start.end [1/1] (short) (narrow) %v325_v36, 16  ;;  %v342_v37 = vrot.slane %v325_v36, 4  ;;  %v347_v47 = vsel %vm294_vm0, 0.0, %v346_v42  ;;  %v363_v48 = vsel %vm294_vm0, %v362_v43, %v214_v46  ;;  %v345_v52 = vsel %vm294_vm0, 0.0, %v344_v49 }
  0xe3   : > { %v369_v51 = vperm.slane %v363_v48, %v2415_v17  ;;  %v373_v4 = vperm.slane %v365_v0, %v2415_v17 }
  0xe4   : > { %v343_v38 = vsel %vm294_vm0, 0.0, %v342_v37 }
  0xe5   : > { %438 = vxpose.xlu2.b32.start.end [1/1] (short) (narrow) %v343_v38, 16  ;;  %v374_v54 = vrot.slane %v369_v51, 4  ;;  %v377_v3 = vsel %vm294_vm0, %v369_v51, %v376_v63  ;;  %v386_v7 = vrot.slane %v373_v4, 4  ;;  %v389_v14 = vsel %vm294_vm0, %v373_v4, %v388_v13 }
  0xe6   : > { %v385_v5 = vperm.slane %v377_v3, %v2424_v30  ;;  %v397_v16 = vperm.slane %v389_v14, %v2424_v30 }
  0xe7   : > { %v375_v58 = vsel %vm294_vm0, %v374_v54, %v357_v56  ;;  %v387_v11 = vsel %vm294_vm0, %v386_v7, %v361_v10 }
  0xe8   : > { %v381_v61 = vperm.slane %v375_v58, %v2424_v30  ;;  %v400_v8 = vrot.slane %v385_v5, 4  ;;  %v393_v9 = vperm.slane %v387_v11, %v2424_v30  ;;  %v404_v21 = vrot.slane %v397_v16, 4 }
  0xea   : > { %v401_v12 = vsel %vm294_vm0, 0.0, %v400_v8  ;;  %v398_v15 = vrot.slane %v381_v61, 4  ;;  %v402_v18 = vrot.slane %v393_v9, 4  ;;  %v405_v22 = vsel %vm294_vm0, 0.0, %v404_v21 }
  0xec   : > { %v399_v19 = vsel %vm294_vm0, 0.0, %v398_v15  ;;  %v403_v20 = vsel %vm294_vm0, 0.0, %v402_v18 }
  0xf0   : > { %566 = vxpose.xlu0.b32.start.end [1/1] (short) (narrow) %v347_v47, 16 }
  0xf2   : > { %470 = vxpose.xlu1.b32.start.end [1/1] (short) (narrow) %v329_v44, 16 }
  0xf5   : > { %502 = vxpose.xlu2.b32.start.end [1/1] (short) (narrow) %v345_v52, 16 }
 0x100   : > { %662 = vxpose.xlu0.b32.start.end [1/1] (short) (narrow) %v381_v61, 16 }
 0x102   : > { %598 = vxpose.xlu1.b32.start.end [1/1] (short) (narrow) %v341_v59, 16 }
 0x105   : > { %630 = vxpose.xlu2.b32.start.end [1/1] (short) (narrow) %v349_v2, 16 }
 0x110   : > { %758 = vxpose.xlu0.b32.start.end [1/1] (short) (narrow) %v401_v12, 16 }
 0x112   : > { %790 = vxpose.xlu1.b32.start.end [1/1] (short) (narrow) %v393_v9, 16 }
 0x115   : > { %726 = vxpose.xlu2.b32.start.end [1/1] (short) (narrow) %v385_v5, 16 }
 0x120   : > { %854 = vxpose.xlu0.b32.start.end [1/1] (short) (narrow) %v397_v16, 16 }
 0x122   : > { %694 = vxpose.xlu1.b32.start.end [1/1] (short) (narrow) %v399_v19, 16 }
 0x125   : > { %822 = vxpose.xlu2.b32.start.end [1/1] (short) (narrow) %v403_v20, 16 }
 0x132   : > { %886 = vxpose.xlu1.b32.start.end [1/1] (short) (narrow) %v405_v22, 16 }
 0x17e   : > { %v454_v23 = vpop.trf.xlu2 }
 0x17f   : > { %v932_v31 = vrot.slane %v454_v23, 4 }
 0x184   : > { %v2461_v24 = vpop.trf.xlu0 }
 0x185   : > { %v944_v12 = vrot.slane %v2461_v24, 4 }
 0x186   : > { %v422_v25 = vpop.trf.xlu1  ;;  %v455_v26 = vpop.trf.xlu2 }
 0x187   : > { %v920_v34 = vrot.slane %v422_v25, 4  ;;  %v1156_v41 = vrot.slane %v455_v26, 4 }
 0x18c   : > { %v2463_v27 = vpop.trf.xlu0 }
 0x18d   : > { %v1168_v14 = vrot.slane %v2463_v27, 4 }
 0x18e   : > { %v423_v28 = vpop.trf.xlu1  ;;  %v518_v29 = vpop.trf.xlu2 }
 0x18f   : > { %v930_v32 = vrot.slane %v518_v29, 4  ;;  %v933_v35 = vsel %vm294_vm0, %v518_v29, %v932_v31  ;;  %v1144_v54 = vrot.slane %v423_v28, 4 }
 0x190   : > { %v941_v42 = vperm.slane %v933_v35, %v2415_v17 }
 0x191   : > { %v931_v36 = vsel %vm294_vm0, %v930_v32, %v454_v23 }
 0x192   : > { %v937_v44 = vperm.slane %v931_v36, %v2415_v17  ;;  %v978_v48 = vrot.slane %v941_v42, 4 }
 0x194   : > { %v582_v33 = vpop.trf.xlu0  ;;  %v966_v53 = vrot.slane %v937_v44, 4 }
 0x195   : > { %v956_v49 = vrot.slane %v582_v33, 4 }
 0x196   : > { %v486_v37 = vpop.trf.xlu1  ;;  %v519_v38 = vpop.trf.xlu2 }
 0x197   : > { %v918_v39 = vrot.slane %v486_v37, 4  ;;  %v921_v40 = vsel %vm294_vm0, %v486_v37, %v920_v34  ;;  %v1154_v46 = vrot.slane %v519_v38, 4  ;;  %v1157_v51 = vsel %vm294_vm0, %v519_v38, %v1156_v41 }
 0x198   : > { %v929_v43 = vperm.slane %v921_v40, %v2415_v17  ;;  %v1165_v61 = vperm.slane %v1157_v51, %v2415_v17 }
 0x199   : > { %v919_v45 = vsel %vm294_vm0, %v918_v39, %v422_v25  ;;  %v1155_v56 = vsel %vm294_vm0, %v1154_v46, %v455_v26 }
 0x19a   : > { %v925_v47 = vperm.slane %v919_v45, %v2415_v17  ;;  %v980_v50 = vrot.slane %v929_v43, 4  ;;  %v979_v55 = vsel %vm294_vm0, %v978_v48, %v929_v43  ;;  %v1161_v4 = vperm.slane %v1155_v56, %v2415_v17 }
 0x19b   : > { %v2482_v3 = vperm.slane %v979_v55, %v2424_v30  ;;  %v1202_v15 = vrot.slane %v1165_v61, 4 }
 0x19c   : > { %v583_v52 = vpop.trf.xlu0  ;;  %v967_v59 = vsel %vm294_vm0, %v966_v53, %v925_v47  ;;  %v968_v60 = vrot.slane %v925_v47, 4  ;;  %v981_v63 = vsel %vm294_vm0, %v941_v42, %v980_v50  ;;  %v1190_v21 = vrot.slane %v1161_v4, 4 }
 0x19d   : > { %v2488_v7 = vperm.slane %v967_v59, %v2424_v30  ;;  %v2496_v13 = vperm.slane %v981_v63, %v2424_v30  ;;  %v1180_v16 = vrot.slane %v583_v52, 4  ;;  %v1024_v20 = vrot.slane %v2482_v3, 4 }
 0x19e   : > { %v487_v57 = vpop.trf.xlu1  ;;  %v646_v58 = vpop.trf.xlu2  ;;  %v969_v9 = vsel %vm294_vm0, %v937_v44, %v968_v60 }
 0x19f   : > { %v1142_v62 = vrot.slane %v487_v57, 4  ;;  %v1145_v0 = vsel %vm294_vm0, %v487_v57, %v1144_v54  ;;  %v954_v1 = vrot.slane %v646_v58, 4  ;;  %v957_v2 = vsel %vm294_vm0, %v646_v58, %v956_v49 }
 0x1a0   : > { %v1153_v6 = vperm.slane %v1145_v0, %v2415_v17  ;;  %v965_v11 = vperm.slane %v957_v2, %v2415_v17  ;;  %v2504_v25 = vperm.slane %v969_v9, %v2424_v30  ;;  %v1016_v26 = vrot.slane %v2488_v7, 4 }
 0x1a1   : > { %v1143_v5 = vsel %vm294_vm0, %v1142_v62, %v423_v28  ;;  %v955_v10 = vsel %vm294_vm0, %v954_v1, %v582_v33  ;;  %v1028_v33 = vrot.slane %v2496_v13, 4 }
 0x1a2   : > { %v1149_v8 = vperm.slane %v1143_v5, %v2415_v17  ;;  %v1204_v18 = vrot.slane %v1153_v6, 4  ;;  %v961_v23 = vperm.slane %v955_v10, %v2415_v17  ;;  %v1203_v28 = vsel %vm294_vm0, %v1202_v15, %v1153_v6 }
 0x1a3   : > { %v1002_v29 = vrot.slane %v965_v11, 4  ;;  %v2516_v42 = vperm.slane %v1203_v28, %v2424_v30 }
 0x1a4   : > { %v2499_v19 = vpop.trf.xlu0  ;;  %v1192_v22 = vrot.slane %v1149_v8, 4  ;;  %v1191_v34 = vsel %vm294_vm0, %v1190_v21, %v1149_v8  ;;  %v1205_v37 = vsel %vm294_vm0, %v1165_v61, %v1204_v18  ;;  %v990_v43 = vrot.slane %v961_v23, 4 }
 0x1a5   : > { %v2524_v49 = vperm.slane %v1191_v34, %v2424_v30  ;;  %v2527_v50 = vperm.slane %v1205_v37, %v2424_v30  ;;  %v1032_v58 = vrot.slane %v2499_v19, 4  ;;  %v1248_v61 = vrot.slane %v2516_v42, 4 }
 0x1a6   : > { %v614_v31 = vpop.trf.xlu1  ;;  %v647_v32 = vpop.trf.xlu2  ;;  %v1193_v41 = vsel %vm294_vm0, %v1161_v4, %v1192_v22 }
 0x1a7   : > { %v942_v35 = vrot.slane %v614_v31, 4  ;;  %v945_v36 = vsel %vm294_vm0, %v614_v31, %v944_v12  ;;  %v1178_v39 = vrot.slane %v647_v32, 4  ;;  %v1181_v40 = vsel %vm294_vm0, %v647_v32, %v1180_v16 }
 0x1a8   : > { %v953_v38 = vperm.slane %v945_v36, %v2415_v17  ;;  %v1189_v53 = vperm.slane %v1181_v40, %v2415_v17  ;;  %v2532_v54 = vperm.slane %v1193_v41, %v2424_v30  ;;  %v1240_v4 = vrot.slane %v2524_v49, 4 }
 0x1a9   : > { %v943_v44 = vsel %vm294_vm0, %v942_v35, %v2461_v24  ;;  %v1179_v48 = vsel %vm294_vm0, %v1178_v39, %v583_v52  ;;  %v1020_v52 = vrot.slane %v2504_v25, 4  ;;  %v1252_v5 = vrot.slane %v2527_v50, 4 }
 0x1aa   : > { %v949_v45 = vperm.slane %v943_v44, %v2415_v17  ;;  %v1003_v46 = vsel %vm294_vm0, %v1002_v29, %v953_v38  ;;  %v1004_v47 = vrot.slane %v953_v38, 4  ;;  %v1185_v60 = vperm.slane %v1179_v48, %v2415_v17 }
 0x1ab   : > { %v1009_v51 = vperm.slane %v1003_v46, %v2424_v30  ;;  %v1226_v8 = vrot.slane %v1189_v53, 4  ;;  %v1244_v10 = vrot.slane %v2532_v54, 4 }
 0x1ac   : > { %v991_v24 = vsel %vm294_vm0, %v990_v43, %v949_v45  ;;  %v992_v55 = vrot.slane %v949_v45, 4  ;;  %v1005_v56 = vsel %vm294_vm0, %v965_v11, %v1004_v47  ;;  %v2536_v57 = vpop.trf.xlu0  ;;  %v1214_v18 = vrot.slane %v1185_v60, 4 }
 0x1ad   : > { %v1013_v59 = vperm.slane %v1005_v56, %v2424_v30  ;;  %v997_v63 = vperm.slane %v991_v24, %v2424_v30  ;;  %v2546_v0 = vsel %vm294_vm0, %v1009_v51, %v1024_v20  ;;  %v1022_v6 = vrot.slane %v1009_v51, 4 }
 0x1ae   : > { %v993_v62 = vsel %vm294_vm0, %v961_v23, %v992_v55  ;;  %v615_v1 = vpop.trf.xlu1  ;;  %v742_v2 = vpop.trf.xlu2  ;;  %v1404_v16 = vrot.slane %v2546_v0, 4  ;;  %v1256_v45 = vrot.slane %v2536_v57, 4 }
 0x1af   : > { %v1026_v11 = vrot.slane %v1013_v59, 4  ;;  %v1166_v12 = vrot.slane %v615_v1, 4  ;;  %v1169_v9 = vsel %vm294_vm0, %v615_v1, %v1168_v14  ;;  %v1001_v15 = vperm.slane %v993_v62, %v2424_v30 }
 0x1b0   : > { %v1177_v20 = vperm.slane %v1169_v9, %v2415_v17  ;;  %v1014_v21 = vrot.slane %v997_v63, 4  ;;  %v1030_v23 = vrot.slane %v742_v2, 4  ;;  %v1033_v28 = vsel %vm294_vm0, %v742_v2, %v1032_v58 }
 0x1b1   : > { %v1167_v22 = vsel %vm294_vm0, %v1166_v12, %v2463_v27  ;;  %v2560_v29 = vsel %vm294_vm0, %v1022_v6, %v2482_v3  ;;  %v2566_v34 = vsel %vm294_vm0, %v1026_v11, %v2496_v13  ;;  %v2569_v35 = vsel %vm294_vm0, %v1013_v59, %v1028_v33 }
 0x1b2   : > { %v1173_v14 = vperm.slane %v1167_v22, %v2415_v17  ;;  %v1227_v31 = vsel %vm294_vm0, %v1226_v8, %v1177_v20  ;;  %v1228_v32 = vrot.slane %v1177_v20, 4  ;;  %v1031_v36 = vsel %vm294_vm0, %v1030_v23, %v2499_v19 }
 0x1b3   : > { %v1233_v27 = vperm.slane %v1227_v31, %v2424_v30  ;;  %v2579_v40 = vperm.slane %v1033_v28, %v2415_v17  ;;  %v2586_v43 = vperm.slane %v1031_v36, %v2415_v17  ;;  %v1018_v44 = vrot.slane %v1001_v15, 4 }
 0x1b4   : > { %v2574_v37 = vpop.trf.xlu0  ;;  %v1215_v3 = vsel %vm294_vm0, %v1214_v18, %v1173_v14  ;;  %v1216_v38 = vrot.slane %v1173_v14, 4  ;;  %v1229_v39 = vsel %vm294_vm0, %v1189_v53, %v1228_v32  ;;  %v1390_v48 = vrot.slane %v2566_v34, 4 }
 0x1b5   : > { %v2582_v13 = vperm.slane %v1215_v3, %v2424_v30  ;;  %v1237_v33 = vperm.slane %v1229_v39, %v2424_v30  ;;  %v1246_v41 = vrot.slane %v1233_v27, 4  ;;  %v2593_v47 = vsel %vm294_vm0, %v1233_v27, %v1248_v61 }
 0x1b6   : > { %v2588_v19 = vpop.trf.xlu1  ;;  %v1217_v46 = vsel %vm294_vm0, %v1185_v60, %v1216_v38  ;;  %v1392_v51 = vrot.slane %v2560_v29, 4  ;;  %v1402_v53 = vrot.slane %v2569_v35, 4  ;;  %v743_v24 = vpop.trf.xlu2  ;;  %v2600_v55 = vsel %vm294_vm0, %v1014_v21, %v2488_v7 }
 0x1b7   : > { %v2603_v56 = vperm.slane %v1217_v46, %v2424_v30  ;;  %v2607_v58 = vsel %vm294_vm0, %v1246_v41, %v2516_v42  ;;  %v1250_v59 = vrot.slane %v1237_v33, 4  ;;  %v2612_v60 = vsel %vm294_vm0, %v997_v63, %v1016_v26 }
 0x1b8   : > { %v1238_v61 = vrot.slane %v2582_v13, 4  ;;  %v1516_v62 = vrot.slane %v2593_v47, 4  ;;  %v1080_v1 = vrot.slane %v2586_v43, 4  ;;  %v1092_v2 = vrot.slane %v2579_v40, 4 }
 0x1b9   : > { %v2619_v6 = vsel %vm294_vm0, %v1237_v33, %v1252_v5  ;;  %v1254_v8 = vrot.slane %v743_v24, 4  ;;  %v2623_v42 = vsel %vm294_vm0, %v1018_v44, %v2504_v25  ;;  %v2628_v7 = vsel %vm294_vm0, %v1001_v15, %v1020_v52 }
 0x1ba   : > { %v1504_v26 = vrot.slane %v2607_v58, 4  ;;  %v1042_v63 = vrot.slane %v2574_v37, 4  ;;  %v1366_v12 = vrot.slane %v2623_v42, 4  ;;  %v1378_v5 = vrot.slane %v2628_v7, 4 }
 0x1bb   : > { %v1242_v9 = vrot.slane %v2603_v56, 4  ;;  %v2639_v18 = vsel %vm294_vm0, %v1250_v59, %v2527_v50  ;;  %v1257_v25 = vsel %vm294_vm0, %v743_v24, %v1256_v45  ;;  %v1391_v52 = vsel %vm294_vm0, %v1390_v48, %v2560_v29 }
 0x1bc   : > { %v2632_v11 = vpop.trf.xlu0  ;;  %v1056_v15 = vrot.slane %v2588_v19, 4  ;;  %v1367_v21 = vsel %vm294_vm0, %v1366_v12, %v2600_v55  ;;  %v1379_v22 = vsel %vm294_vm0, %v1378_v5, %v2612_v60  ;;  %v1397_v23 = vperm.slane %v1391_v52, %v2415_v17 }
 0x1bd   : > { %v1514_v50 = vrot.slane %v2619_v6, 4  ;;  %v1255_v28 = vsel %vm294_vm0, %v1254_v8, %v2536_v57  ;;  %v1373_v14 = vperm.slane %v1367_v21, %v2415_v17  ;;  %v1385_v31 = vperm.slane %v1379_v22, %v2415_v17 }
 0x1be   : > { %v2645_v20 = vpop.trf.xlu1  ;;  %v1502_v32 = vrot.slane %v2639_v18, 4  ;;  %v2659_v27 = vperm.slane %v1257_v25, %v2415_v17  ;;  %v1403_v36 = vsel %vm294_vm0, %v1402_v53, %v2546_v0  ;;  %v1440_v3 = vrot.slane %v1397_v23, 4 }
 0x1bf   : > { %v1409_v38 = vperm.slane %v1403_v36, %v2415_v17  ;;  %v1416_v39 = vrot.slane %v1373_v14, 4  ;;  %v1414_v33 = vrot.slane %v1385_v31, 4  ;;  %v2666_v57 = vsel %vm294_vm0, %v1242_v9, %v2532_v54 }
 0x1c0   : > { %v2669_v41 = vperm.slane %v1255_v28, %v2415_v17  ;;  %v1266_v44 = vrot.slane %v2632_v11, 4  ;;  %v1380_v45 = vrot.slane %v2612_v60, 4  ;;  %v1478_v46 = vrot.slane %v2666_v57, 4 }
 0x1c1   : > { %v1417_v48 = vsel %vm294_vm0, %v1385_v31, %v1416_v39  ;;  %v1441_v53 = vsel %vm294_vm0, %v1409_v38, %v1440_v3  ;;  %v1415_v24 = vsel %vm294_vm0, %v1414_v33, %v1373_v14  ;;  %v1438_v59 = vrot.slane %v1409_v38, 4 }
 0x1c2   : > { %v1425_v8 = vperm.slane %v1417_v48, %v2424_v30  ;;  %v1449_v12 = vperm.slane %v1441_v53, %v2424_v30  ;;  %v2680_v5 = vperm.slane %v1415_v24, %v2424_v30  ;;  %v2684_v25 = vsel %vm294_vm0, %v1238_v61, %v2524_v49 }
 0x1c3   : > { %v1316_v52 = vrot.slane %v2659_v27, 4  ;;  %v1439_v21 = vsel %vm294_vm0, %v1438_v59, %v1397_v23  ;;  %v1479_v28 = vsel %vm294_vm0, %v1478_v46, %v2684_v25  ;;  %v2700_v23 = vsel %vm294_vm0, %v2582_v13, %v1240_v4 }
 0x1c4   : > { %v870_v9 = vpop.trf.xlu0  ;;  %v1466_v14 = vrot.slane %v1449_v12, 4  ;;  %v2691_v31 = vperm.slane %v1439_v21, %v2424_v30  ;;  %v1464_v36 = vrot.slane %v2680_v5, 4  ;;  %v2706_v33 = vsel %vm294_vm0, %v2603_v56, %v1244_v10 }
 0x1c5   : > { %v1054_v22 = vrot.slane %v870_v9, 4  ;;  %v1057_v3 = vsel %vm294_vm0, %v870_v9, %v1056_v15  ;;  %v1485_v49 = vperm.slane %v1479_v28, %v2415_v17  ;;  %v1304_v48 = vrot.slane %v2669_v41, 4 }
 0x1c6   : > { %v710_v38 = vpop.trf.xlu1  ;;  %v1467_v46 = vsel %vm294_vm0, %v1466_v14, %v1425_v8  ;;  %v1465_v15 = vsel %vm294_vm0, %v2691_v31, %v1464_v36  ;;  %v2718_v54 = vperm.slane %v1057_v3, %v2415_v17  ;;  %v1490_v56 = vrot.slane %v2706_v33, 4 }
 0x1c7   : > { %v1043_v61 = vsel %vm294_vm0, %v1042_v63, %v710_v38  ;;  %v1044_v39 = vrot.slane %v710_v38, 4  ;;  %v1055_v63 = vsel %vm294_vm0, %v1054_v22, %v2588_v19  ;;  %1824 = vrot.lane.b32.xlu1 %v1467_v46, %s2305_s16  ;;  %1816 = vrot.lane.b32.xlu2 %v1465_v15, %s2306_s17  ;;  %v1468_v19 = vrot.slane %v1425_v8, 4 }
 0x1c8   : > { %v1049_v10 = vperm.slane %v1043_v61, %v2415_v17  ;;  %v1503_v53 = vsel %vm294_vm0, %v1502_v32, %v2607_v58  ;;  %v1280_v24 = vrot.slane %v2645_v20, 4  ;;  %v2729_v59 = vperm.slane %v1055_v63, %v2415_v17 }
 0x1c9   : > { %v1045_v4 = vsel %vm294_vm0, %v2574_v37, %v1044_v39  ;;  %v1509_v9 = vperm.slane %v1503_v53, %v2415_v17  ;;  %v1515_v37 = vsel %vm294_vm0, %v1514_v50, %v2593_v47  ;;  %v1480_v22 = vrot.slane %v2684_v25, 4 }
 0x1ca   : > { %v1053_v13 = vperm.slane %v1045_v4, %v2415_v17  ;;  %v1078_v21 = vrot.slane %v1049_v10, 4  ;;  %v1081_v8 = vsel %vm294_vm0, %v1049_v10, %v1080_v1  ;;  %v1491_v32 = vsel %vm294_vm0, %v1490_v56, %v2700_v23 }
 0x1cb   : > { %v1492_v14 = vrot.slane %v2700_v23, 4  ;;  %v1497_v36 = vperm.slane %v1491_v32, %v2415_v17  ;;  %v1521_v3 = vperm.slane %v1515_v37, %v2415_v17  ;;  %v1116_v50 = vrot.slane %v2718_v54, 4 }
 0x1cc   : > { %v1090_v28 = vrot.slane %v1053_v13, 4  ;;  %v871_v38 = vpop.trf.xlu0  ;;  %v1093_v61 = vsel %vm294_vm0, %v1053_v13, %v1092_v2  ;;  %v1469_v1 = vsel %vm294_vm0, %v1449_v12, %v1468_v19  ;;  %v1528_v39 = vrot.slane %v1485_v49, 4 }
 0x1cd   : > { %v1104_v46 = vrot.slane %v2729_v59, 4  ;;  %v2750_v15 = vperm.slane %v1081_v8, %v2424_v30  ;;  %v1552_v63 = vrot.slane %v1509_v9, 4  ;;  %v1526_v4 = vrot.slane %v1497_v36, 4 }
 0x1ce   : > { %v1079_v10 = vsel %vm294_vm0, %v1078_v21, %v2586_v43  ;;  %v1529_v56 = vsel %vm294_vm0, %v1497_v36, %v1528_v39  ;;  %v1550_v53 = vrot.slane %v1521_v3, 4  ;;  %v1278_v37 = vrot.slane %v871_v38, 4  ;;  %v711_v32 = vpop.trf.xlu1 }
 0x1cf   : > { %v1091_v2 = vsel %vm294_vm0, %v1090_v28, %v2579_v40  ;;  %v2758_v12 = vperm.slane %v1093_v61, %v2424_v30  ;;  %1832 = vrot.lane.b32.xlu1 %v1469_v1, %s2307_s18  ;;  %v1553_v13 = vsel %vm294_vm0, %v1521_v3, %v1552_v63  ;;  %v1527_v19 = vsel %vm294_vm0, %v1526_v4, %v1485_v49 }
 0x1d0   : > { %v1537_v43 = vperm.slane %v1529_v56, %v2424_v30  ;;  %v1561_v21 = vperm.slane %v1553_v13, %v2424_v30  ;;  %v2766_v8 = vperm.slane %v1527_v19, %v2424_v30  ;;  %v1551_v36 = vsel %vm294_vm0, %v1550_v53, %v1509_v9 }
 0x1d1   : > { %v2770_v40 = vperm.slane %v1079_v10, %v2424_v30  ;;  %v1132_v28 = vrot.slane %v2750_v15, 4  ;;  %v1279_v61 = vsel %vm294_vm0, %v1278_v37, %v2645_v20  ;;  %v1267_v49 = vsel %vm294_vm0, %v1266_v44, %v711_v32 }
 0x1d2   : > { %v1578_v3 = vrot.slane %v1561_v21, 4  ;;  %v2779_v1 = vperm.slane %v1551_v36, %v2424_v30  ;;  %v1576_v39 = vrot.slane %v2766_v8, 4  ;;  %v1268_v63 = vrot.slane %v711_v32, 4 }
 0x1d3   : > { %v2783_v9 = vperm.slane %v1091_v2, %v2424_v30  ;;  %v1140_v4 = vrot.slane %v2758_v12, 4  ;;  %v1273_v10 = vperm.slane %v1267_v49, %v2415_v17  ;;  %v1368_v20 = vrot.slane %v2600_v55, 4 }
 0x1d4   : > { %v1579_v56 = vsel %vm294_vm0, %v1578_v3, %v1537_v43  ;;  %v1577_v44 = vsel %vm294_vm0, %v2779_v1, %v1576_v39  ;;  %v2792_v53 = vperm.slane %v1279_v61, %v2415_v17  ;;  %v1269_v37 = vsel %vm294_vm0, %v2632_v11, %v1268_v63 }
 0x1d5   : > { %1826 = vrot.lane.b32.xlu2 %v1579_v56, %s2305_s16  ;;  %1818 = vrot.lane.b32.xlu0 %v1577_v44, %s2306_s17  ;;  %v1281_v32 = vsel %vm294_vm0, %v871_v38, %v1280_v24  ;;  %v1277_v2 = vperm.slane %v1269_v37, %v2415_v17  ;;  %v1302_v55 = vrot.slane %v1273_v10, 4  ;;  %v1369_v13 = vsel %vm294_vm0, %v2623_v42, %v1368_v20 }
 0x1d6   : > { %v1305_v19 = vsel %vm294_vm0, %v1273_v10, %v1304_v48  ;;  %v2806_v36 = vperm.slane %v1369_v13, %v2415_v17  ;;  %v1381_v11 = vsel %vm294_vm0, %v2628_v7, %v1380_v45  ;;  %v1393_v24 = vsel %vm294_vm0, %v2566_v34, %v1392_v51  ;;  %v838_v10 = vpop.trf.xlu2  ;;  %v902_v20 = vpop.trf.xlu1 }
 0x1d7   : > { %v1303_v42 = vsel %vm294_vm0, %v1302_v55, %v2669_v41  ;;  %v1314_v38 = vrot.slane %v1277_v2, 4  ;;  %v1317_v48 = vsel %vm294_vm0, %v1277_v2, %v1316_v52  ;;  %v2822_v61 = vperm.slane %v1381_v11, %v2415_v17 }
 0x1d8   : > { %v1128_v60 = vrot.slane %v2770_v40, 4  ;;  %v1136_v7 = vrot.slane %v2783_v9, 4  ;;  %v2827_v29 = vperm.slane %v1281_v32, %v2415_v17  ;;  %v1328_v34 = vrot.slane %v2792_v53, 4 }
 0x1d9   : > { %v2831_v51 = vperm.slane %v1305_v19, %v2424_v30  ;;  %v1405_v41 = vsel %vm294_vm0, %v2569_v35, %v1404_v16  ;;  %v1426_v45 = vrot.slane %v2822_v61, 4  ;;  %v1580_v52 = vrot.slane %v1537_v43, 4 }
 0x1da   : > { %v2839_v49 = vperm.slane %v1303_v42, %v2424_v30  ;;  %v2842_v3 = vperm.slane %v1317_v48, %v2424_v30  ;;  %v2845_v39 = vperm.slane %v1393_v24, %v2415_v17  ;;  %v2848_v63 = vperm.slane %v1405_v41, %v2415_v17 }
 0x1db   : > { %v1315_v0 = vsel %vm294_vm0, %v1314_v38, %v2659_v27  ;;  %v1427_v16 = vsel %vm294_vm0, %v1426_v45, %v2806_v36  ;;  %v1481_v35 = vsel %vm294_vm0, %v2666_v57, %v1480_v22  ;;  %v1493_v43 = vsel %vm294_vm0, %v2706_v33, %v1492_v14 }
 0x1dc   : > { %v1433_v56 = vperm.slane %v1427_v16, %v2424_v30  ;;  %v1450_v44 = vrot.slane %v2848_v63, 4  ;;  %v1581_v27 = vsel %vm294_vm0, %v1561_v21, %v1580_v52  ;;  %v2866_v37 = vperm.slane %v1481_v35, %v2415_v17 }
 0x1dd   : > { %1834 = vrot.lane.b32.xlu2 %v1581_v27, %s2307_s18  ;;  %v2870_v25 = vperm.slane %v1493_v43, %v2415_v17  ;;  %v1505_v57 = vsel %vm294_vm0, %v2639_v18, %v1504_v26  ;;  %v1517_v23 = vsel %vm294_vm0, %v2619_v6, %v1516_v62  ;;  %v1068_v33 = vrot.slane %v838_v10, 4  ;;  %s1996_s18 = scalar_lea.hbm %s3234_s1, %s2103_s13 }
 0x1de   : > { %v1451_v22 = vsel %vm294_vm0, %v1450_v44, %v2845_v39  ;;  %v2883_v14 = vperm.slane %v1505_v57, %v2415_v17  ;;  %v2886_v21 = vperm.slane %v1517_v23, %v2415_v17  ;;  %v1066_v32 = vrot.slane %v902_v20, 4  ;;  %s1999_s9 = sshll.u32 %s1996_s18, 4  ;;  %s2000_s9 = int_to_ptr.hbm [resolvable:$true] %s1999_s9 }
 0x1df   : > { %v2889_v58 = vperm.slane %v1315_v0, %v2424_v30  ;;  %v1457_v26 = vperm.slane %v1451_v22, %v2424_v30  ;;  %v1538_v47 = vrot.slane %v2870_v25, 4  ;;  %v1069_v62 = vsel %vm294_vm0, %v902_v20, %v1068_v33 }
 0x1e0   : > { %v1562_v6 = vrot.slane %v2886_v21, 4  ;;  %v1067_v18 = vsel %vm294_vm0, %v1066_v32, %v838_v10  ;;  %v1077_v2 = vperm.slane %v1069_v62, %v2415_v17  ;;  %v1472_v55 = vrot.slane %v1433_v56, 4 }
 0x1e1   : > { %v1470_v13 = vrot.slane %v1457_v26, 4  ;;  %v1539_v19 = vsel %vm294_vm0, %v1538_v47, %v2866_v37  ;;  %v1073_v11 = vperm.slane %v1067_v18, %v2415_v17  ;;  %v1428_v24 = vrot.slane %v2806_v36, 4  ;;  %v903_v18 = vpop.trf.xlu1 }
 0x1e2   : > { %v1545_v42 = vperm.slane %v1539_v19, %v2424_v30  ;;  %v1563_v38 = vsel %vm294_vm0, %v1562_v6, %v2883_v14  ;;  %v1114_v48 = vrot.slane %v1077_v2, 4  ;;  %v1117_v41 = vsel %vm294_vm0, %v1077_v2, %v1116_v50  ;;  %v839_v6 = vpop.trf.xlu2 }
 0x1e3   : > { %v1471_v45 = vsel %vm294_vm0, %v1470_v13, %v1433_v56  ;;  %v1569_v52 = vperm.slane %v1563_v38, %v2424_v30  ;;  %v1102_v10 = vrot.slane %v1073_v11, 4  ;;  %v1105_v0 = vsel %vm294_vm0, %v1073_v11, %v1104_v46 }
 0x1e4   : > { %1840 = vrot.lane.b32.xlu1 %v1471_v45, %s2308_s22  ;;  %v1584_v36 = vrot.slane %v1545_v42, 4  ;;  %v1113_v16 = vperm.slane %v1105_v0, %v2424_v30  ;;  %v1115_v35 = vsel %vm294_vm0, %v1114_v48, %v2718_v54  ;;  %v2917_v50 = vperm.slane %v1117_v41, %v2424_v30 }
 0x1e5   : > { %v1340_v43 = vrot.slane %v2827_v29, 4  ;;  %v1103_v20 = vsel %vm294_vm0, %v1102_v10, %v2729_v59  ;;  %v1121_v56 = vperm.slane %v1115_v35, %v2424_v30  ;;  %v1582_v46 = vrot.slane %v1569_v52, 4 }
 0x1e6   : > { %v1356_v44 = vrot.slane %v2831_v51, 4  ;;  %v1585_v27 = vsel %vm294_vm0, %v1569_v52, %v1584_v36  ;;  %v2926_v57 = vperm.slane %v1103_v20, %v2424_v30  ;;  %v1429_v54 = vsel %vm294_vm0, %v2822_v61, %v1428_v24 }
 0x1e7   : > { %v1352_v23 = vrot.slane %v2839_v49, 4  ;;  %v1364_v33 = vrot.slane %v2842_v3, 4  ;;  %1850 = vrot.lane.b32.xlu0 %v1585_v27, %s2309_s23  ;;  %v2935_v59 = vsel %vm294_vm0, %v1113_v16, %v1132_v28  ;;  %v2941_v22 = vsel %vm294_vm0, %v2917_v50, %v1140_v4 }
 0x1e8   : > { %v1360_v32 = vrot.slane %v2889_v58, 4  ;;  %v1130_v61 = vrot.slane %v1113_v16, 4  ;;  %v1134_v47 = vrot.slane %v1121_v56, 4  ;;  %v1473_v62 = vsel %vm294_vm0, %v1457_v26, %v1472_v55 }
 0x1e9   : > { %v2948_v2 = vsel %vm294_vm0, %v1121_v56, %v1136_v7  ;;  %v1138_v28 = vrot.slane %v2917_v50, 4  ;;  %v1583_v13 = vsel %vm294_vm0, %v1582_v46, %v1545_v42  ;;  %v1437_v4 = vperm.slane %v1429_v54, %v2424_v30 }
 0x1ea   : > { %v1126_v19 = vrot.slane %v2926_v57, 4  ;;  %v1602_v11 = vrot.slane %v2935_v59, 4  ;;  %v1626_v24 = vrot.slane %v2941_v22, 4  ;;  %1842 = vrot.lane.b32.xlu2 %v1583_v13, %s2308_s22  ;;  %v1452_v26 = vrot.slane %v2845_v39, 4  ;;  %s154_s22 = scalar_lea.vmem [#allocation5], %s2096_s12 }
 0x1eb   : > { %v1476_v55 = vrot.slane %v1437_v4, 4  ;;  %v1292_v38 = vrot.slane %v839_v6, 4  ;;  %v1290_v7 = vrot.slane %v903_v18, 4  ;;  %v1540_v48 = vrot.slane %v2866_v37, 4 }
 0x1ec   : > { %v2961_v42 = vsel %vm294_vm0, %v1134_v47, %v2783_v9  ;;  %v1628_v41 = vrot.slane %v2948_v2, 4  ;;  %1848 = vrot.lane.b32.xlu1 %v1473_v62, %s2309_s23  ;;  %v1453_v45 = vsel %vm294_vm0, %v2848_v63, %v1452_v26  ;;  %v1564_v52 = vrot.slane %v2883_v14, 4  ;;  %s1997_s23 = sshll.u32 %s154_s22, 4  ;;  %s1998_s23 = int_to_ptr.vmem [resolvable:$true] %s1997_s23 }
 0x1ed   : > { %v1461_v10 = vperm.slane %v1453_v45, %v2424_v30  ;;  %v1291_v39 = vsel %vm294_vm0, %v1290_v7, %v839_v6  ;;  %v1293_v0 = vsel %vm294_vm0, %v903_v18, %v1292_v38  ;;  %v1541_v37 = vsel %vm294_vm0, %v2870_v25, %v1540_v48 }
 0x1ee   : > { %v1297_v9 = vperm.slane %v1291_v39, %v2415_v17  ;;  %v1301_v36 = vperm.slane %v1293_v0, %v2415_v17  ;;  %v1549_v16 = vperm.slane %v1541_v37, %v2424_v30  ;;  %v1565_v63 = vsel %vm294_vm0, %v2886_v21, %v1564_v52 }
 0x1ef   : > { %v1477_v14 = vsel %vm294_vm0, %v1461_v10, %v1476_v55  ;;  %v1573_v35 = vperm.slane %v1565_v63, %v2424_v30  ;;  %v1474_v50 = vrot.slane %v1461_v10, 4  ;;  %v2981_v20 = vsel %vm294_vm0, %v1130_v61, %v2750_v15 }
 0x1f0   : > { %1864 = vrot.lane.b32.xlu0 %v1477_v14, %s2310_s24  ;;  %v1326_v25 = vrot.slane %v1297_v9, 4  ;;  %v1329_v56 = vsel %vm294_vm0, %v1297_v9, %v1328_v34  ;;  %v1338_v46 = vrot.slane %v1301_v36, 4  ;;  %v1341_v21 = vsel %vm294_vm0, %v1301_v36, %v1340_v43 }
 0x1f1   : > { %v1337_v27 = vperm.slane %v1329_v56, %v2424_v30  ;;  %v1349_v54 = vperm.slane %v1341_v21, %v2424_v30  ;;  %v1586_v47 = vrot.slane %v1573_v35, 4  ;;  %v1475_v62 = vsel %vm294_vm0, %v1474_v50, %v1437_v4 }
 0x1f2   : > { %v2993_v15 = vsel %vm294_vm0, %v1138_v28, %v2758_v12  ;;  %v1327_v61 = vsel %vm294_vm0, %v1326_v25, %v2792_v53  ;;  %v1339_v34 = vsel %vm294_vm0, %v1338_v46, %v2827_v29  ;;  %1856 = vrot.lane.b32.xlu2 %v1475_v62, %s2311_s25  ;;  %v1590_v43 = vrot.slane %v2981_v20, 4 }
 0x1f3   : > { %v1333_v6 = vperm.slane %v1327_v61, %v2424_v30  ;;  %v1345_v18 = vperm.slane %v1339_v34, %v2424_v30  ;;  %v1588_v13 = vrot.slane %v1549_v16, 4  ;;  %v3004_v4 = vsel %vm294_vm0, %v1126_v19, %v2770_v40 }
 0x1f4   : > { %v3009_v12 = vsel %vm294_vm0, %v1337_v27, %v1356_v44  ;;  %v1362_v53 = vrot.slane %v1349_v54, 4  ;;  %v3014_v29 = vsel %vm294_vm0, %v1349_v54, %v1364_v33  ;;  %v1587_v28 = vsel %vm294_vm0, %v1586_v47, %v1549_v16 }
 0x1f5   : > { %v1614_v26 = vrot.slane %v2993_v15, 4  ;;  %v1350_v55 = vrot.slane %v1333_v6, 4  ;;  %v1358_v38 = vrot.slane %v1345_v18, 4  ;;  %1858 = vrot.lane.b32.xlu1 %v1587_v28, %s2311_s25  ;;  %v3022_v19 = vsel %vm294_vm0, %v2926_v57, %v1128_v60  ;;  %s2231_s25 = sshra.s32 %s2000_s9, 4  ;;  %s2232_s25 = int_to_ptr.hbm [resolvable:$true] %s2231_s25 }
 0x1f6   : > { %v1616_v44 = vrot.slane %v2961_v42, 4  ;;  %v1354_v7 = vrot.slane %v1337_v27, 4  ;;  %v3027_v33 = vsel %vm294_vm0, %v1362_v53, %v2842_v3  ;;  %v1591_v48 = vsel %vm294_vm0, %v1590_v43, %v3004_v4  ;;  %p2238_p7 = scmp.lt.s32.totalorder %s2232_s25, %s3234_s1 }
 0x1f7   : > { %v3034_v45 = vsel %vm294_vm0, %v1345_v18, %v1360_v32  ;;  %v1714_v40 = vrot.slane %v3009_v12, 4  ;;  %v1738_v60 = vrot.slane %v3014_v29, 4  ;;  %v1589_v57 = vsel %vm294_vm0, %v1573_v35, %v1588_v13 }
 0x1f8   : > { %v3041_v52 = vsel %vm294_vm0, %v1358_v38, %v2889_v58  ;;  %v1726_v3 = vrot.slane %v3027_v33, 4  ;;  %v1597_v10 = vperm.slane %v1591_v48, %v2415_v17  ;;  %v1603_v32 = vsel %vm294_vm0, %v1602_v11, %v3022_v19 }
 0x1f9   : > { %v1609_v39 = vperm.slane %v1603_v32, %v2415_v17  ;;  %v1615_v0 = vsel %vm294_vm0, %v1614_v26, %v2961_v42  ;;  %v1627_v58 = vsel %vm294_vm0, %v1626_v24, %v2948_v2  ;;  %v3058_v37 = vsel %vm294_vm0, %v1350_v55, %v2839_v49 }
 0x1fa   : > { %1866 = vrot.lane.b32.xlu2 %v1589_v57, %s2310_s24  ;;  %v1621_v9 = vperm.slane %v1615_v0, %v2415_v17  ;;  %v1633_v11 = vperm.slane %v1627_v58, %v2415_v17  ;;  %v3066_v36 = vsel %vm294_vm0, %v1333_v6, %v1352_v23  ;;  %v3070_v16 = vsel %vm294_vm0, %v1354_v7, %v2831_v51  ;;  %s1983_s24 = scalar_lea.sflag [#allocation4], %s2405_s5 }
 0x1fb   : > { %v1629_v24 = vsel %vm294_vm0, %v2941_v22, %v1628_v41  ;;  %v1638_v63 = vrot.slane %v1609_v39, 4  ;;  %v1702_v14 = vrot.slane %v3070_v16, 4  ;;  %v1715_v35 = vsel %vm294_vm0, %v1714_v40, %v3066_v36 }
 0x1fc   : > { %v1592_v49 = vrot.slane %v3004_v4, 4  ;;  %v1662_v50 = vrot.slane %v1633_v11, 4  ;;  %v1721_v23 = vperm.slane %v1715_v35, %v2415_v17  ;;  %v1727_v51 = vsel %vm294_vm0, %v1726_v3, %v3041_v52 }
 0x1fd   : > { %v1639_v25 = vsel %vm294_vm0, %v1638_v63, %v1597_v10  ;;  %v1703_v2 = vsel %vm294_vm0, %v1702_v14, %v3058_v37  ;;  %v1733_v22 = vperm.slane %v1727_v51, %v2415_v17  ;;  %v1739_v41 = vsel %vm294_vm0, %v1738_v60, %v3034_v45 }
 0x1fe   : > { %v1645_v56 = vperm.slane %v1639_v25, %v2424_v30  ;;  %v1663_v46 = vsel %vm294_vm0, %v1662_v50, %v1621_v9  ;;  %v1709_v21 = vperm.slane %v1703_v2, %v2415_v17  ;;  %v1745_v27 = vperm.slane %v1739_v41, %v2415_v17 }
 0x1ff   : > { %v1604_v54 = vrot.slane %v3022_v19, 4  ;;  %v1669_v47 = vperm.slane %v1663_v46, %v2424_v30  ;;  %v1750_v62 = vrot.slane %v1721_v23, 4  ;;  %v1776_v61 = vrot.slane %v1733_v22, 4 }
 0x200   : > { %v1688_v34 = vrot.slane %v1645_v56, 4  ;;  %v1774_v43 = vrot.slane %v1745_v27, 4  ;;  %v1752_v6 = vrot.slane %v1709_v21, 4  ;;  %v1664_v18 = vrot.slane %v1621_v9, 4 }
 0x201   : > { %v1686_v13 = vrot.slane %v1669_v47, 4  ;;  %v1751_v4 = vsel %vm294_vm0, %v1750_v62, %v1709_v21  ;;  %v1777_v53 = vsel %vm294_vm0, %v1745_v27, %v1776_v61  ;;  %v1640_v28 = vrot.slane %v1597_v10, 4 }
 0x202   : > { %v1689_v26 = vsel %vm294_vm0, %v1669_v47, %v1688_v34  ;;  %v1757_v55 = vperm.slane %v1751_v4, %v2424_v30  ;;  %v1775_v38 = vsel %vm294_vm0, %v1774_v43, %v1733_v22  ;;  %v1753_v19 = vsel %vm294_vm0, %v1721_v23, %v1752_v6 }
 0x203   : > { %v1740_v7 = vrot.slane %v3034_v45, 4  ;;  %v1687_v48 = vsel %vm294_vm0, %v1686_v13, %v1645_v56  ;;  %1880 = vrot.lane.b32.xlu2 %v1689_v26, %s2312_s26  ;;  %v1781_v40 = vperm.slane %v1775_v38, %v2424_v30  ;;  %v3106_v60 = vperm.slane %v1777_v53, %v2424_v30 }
 0x204   : > { %1872 = vrot.lane.b32.xlu1 %v1687_v48, %s2313_s27  ;;  %v1704_v57 = vrot.slane %v3058_v37, 4  ;;  %v1716_v3 = vrot.slane %v3066_v36, 4  ;;  %v1665_v10 = vsel %vm294_vm0, %v1633_v11, %v1664_v18  ;;  %v1593_v45 = vsel %vm294_vm0, %v2981_v20, %v1592_v49 }
 0x205   : > { %v1798_v32 = vrot.slane %v1781_v40, 4  ;;  %v1800_v0 = vrot.slane %v1757_v55, 4  ;;  %v1761_v58 = vperm.slane %v1753_v19, %v2424_v30  ;;  %v1641_v9 = vsel %vm294_vm0, %v1609_v39, %v1640_v28 }
 0x206   : > { %v1802_v63 = vrot.slane %v3106_v60, 4  ;;  %v1673_v14 = vperm.slane %v1665_v10, %v2424_v30  ;;  %v1605_v37 = vsel %vm294_vm0, %v2935_v59, %v1604_v54  ;;  %v1617_v11 = vsel %vm294_vm0, %v2993_v15, %v1616_v44 }
 0x207   : > { %v1728_v20 = vrot.slane %v3041_v52, 4  ;;  %v1799_v36 = vsel %vm294_vm0, %v1798_v32, %v1757_v55  ;;  %v1601_v35 = vperm.slane %v1593_v45, %v2415_v17  ;;  %v1613_v39 = vperm.slane %v1605_v37, %v2415_v17 }
 0x208   : > { %v1741_v49 = vsel %vm294_vm0, %v3014_v29, %v1740_v7  ;;  %1874 = vrot.lane.b32.xlu0 %v1799_v36, %s2313_s27  ;;  %v1649_v50 = vperm.slane %v1641_v9, %v2424_v30  ;;  %v1625_v59 = vperm.slane %v1617_v11, %v2415_v17  ;;  %v1637_v42 = vperm.slane %v1629_v24, %v2415_v17 }
 0x209   : > { %v1801_v15 = vsel %vm294_vm0, %v1781_v40, %v1800_v0  ;;  %v1650_v44 = vrot.slane %v1613_v39, 4  ;;  %v1705_v52 = vsel %vm294_vm0, %v3070_v16, %v1704_v57  ;;  %v1717_v23 = vsel %vm294_vm0, %v3009_v12, %v1716_v3 }
 0x20a   : > { %v1803_v51 = vsel %vm294_vm0, %v1802_v63, %v1761_v58  ;;  %v1690_v25 = vrot.slane %v1673_v14, 4  ;;  %v1674_v29 = vrot.slane %v1637_v42, 4  ;;  %v1725_v2 = vperm.slane %v1717_v23, %v2415_v17 }
 0x20b   : > { %1890 = vrot.lane.b32.xlu2 %v1803_v51, %s2314_s28  ;;  %v1651_v22 = vsel %vm294_vm0, %v1650_v44, %v1601_v35  ;;  %v1713_v24 = vperm.slane %v1705_v52, %v2415_v17  ;;  %v1729_v41 = vsel %vm294_vm0, %v3027_v33, %v1728_v20  ;;  %v1749_v16 = vperm.slane %v1741_v49, %v2415_v17 }
 0x20c   : > { %1882 = vrot.lane.b32.xlu1 %v1801_v15, %s2312_s26  ;;  %v1675_v12 = vsel %vm294_vm0, %v1674_v29, %v1625_v59  ;;  %v1737_v56 = vperm.slane %v1729_v41, %v2415_v17  ;;  %v1762_v46 = vrot.slane %v1725_v2, 4  ;;  %v1657_v54 = vperm.slane %v1651_v22, %v2424_v30  ;;  %s2233_s26 = scalar_lea.hbm %s2232_s25, 16 }
 0x20d   : > { %v1681_v21 = vperm.slane %v1675_v12, %v2424_v30  ;;  %v1786_v27 = vrot.slane %v1749_v16, 4  ;;  %v1691_v47 = vsel %vm294_vm0, %v1690_v25, %v1649_v50  ;;  %v1692_v62 = vrot.slane %v1649_v50, 4  ;;  %p2234_p4 = scmp.ne.s32.totalorder %s2232_s25, %s2233_s26 }
 0x20e   : > { %v1763_v33 = vsel %vm294_vm0, %v1762_v46, %v1713_v24  ;;  %v1804_v18 = vrot.slane %v1761_v58, 4  ;;  %v1652_v4 = vrot.slane %v1601_v35, 4  ;;  %v1676_v53 = vrot.slane %v1625_v59, 4 }
 0x20f   : > { %v1694_v61 = vrot.slane %v1681_v21, 4  ;;  %v1787_v34 = vsel %vm294_vm0, %v1786_v27, %v1737_v56  ;;  %v1769_v6 = vperm.slane %v1763_v33, %v2424_v30  ;;  %v1693_v17 = vsel %vm294_vm0, %v1673_v14, %v1692_v62  ;;  %p2235_p5 = pnand %p2234_p4, %p2382_p9 }
 0x210   : > { %1888 = vrot.lane.b32.xlu0 %v1691_v47, %s2314_s28  ;;  %v1793_v13 = vperm.slane %v1787_v34, %v2424_v30  ;;  %v1805_v26 = vsel %vm294_vm0, %v3106_v60, %v1804_v18  ;;  %v1653_v38 = vsel %vm294_vm0, %v1613_v39, %v1652_v4  ;;  %v1677_v19 = vsel %vm294_vm0, %v1637_v42, %v1676_v53 }
 0x211   : > { %v1695_v43 = vsel %vm294_vm0, %v1694_v61, %v1657_v54  ;;  %v1808_v28 = vrot.slane %v1769_v6, 4  ;;  %v1788_v7 = vrot.slane %v1737_v56, 4  ;;  %v1661_v40 = vperm.slane %v1653_v38, %v2424_v30  ;;  %p2236_p6 = pneg %p2235_p5 }
 0x212   : > { %v1806_v55 = vrot.slane %v1793_v13, 4  ;;  %v1696_v3 = vrot.slane %v1657_v54, 4  ;;  %v1685_v10 = vperm.slane %v1677_v19, %v2424_v30  ;;  %v1764_v60 = vrot.slane %v1713_v24, 4 }
 0x213   : > { %1904 = vrot.lane.b32.xlu2 %v1695_v43, %s2315_s29  ;;  %v1809_v48 = vsel %vm294_vm0, %v1793_v13, %v1808_v28  ;;  %v1789_v45 = vsel %vm294_vm0, %v1749_v16, %v1788_v7  ;;  %v1462_v32 = vrot.slane %v2691_v31, 4  ;;  %v1700_v0 = vrot.slane %v1661_v40, 4 }
 0x214   : > { %1896 = vrot.lane.b32.xlu1 %v1693_v17, %s2316_s30  ;;  %v1807_v57 = vsel %vm294_vm0, %v1806_v55, %v1769_v6  ;;  %v1697_v58 = vsel %vm294_vm0, %v1681_v21, %v1696_v3  ;;  %v1698_v9 = vrot.slane %v1685_v10, 4  ;;  %v1797_v63 = vperm.slane %v1789_v45, %v2424_v30 }
 0x215   : > { %v1765_v14 = vsel %vm294_vm0, %v1725_v2, %v1764_v60  ;;  %v1463_v11 = vsel %vm294_vm0, %v1462_v32, %v2680_v5  ;;  %v1701_v20 = vsel %vm294_vm0, %v1685_v10, %v1700_v0  ;;  %v1574_v42 = vrot.slane %v2779_v1, 4 }
 0x216   : > { %v1699_v31 = vsel %vm294_vm0, %v1698_v9, %v1661_v40  ;;  %v1773_v35 = vperm.slane %v1765_v14, %v2424_v30  ;;  %v1810_v39 = vrot.slane %v1797_v63, 4 }
 0x217   : > { %v1575_v52 = vsel %vm294_vm0, %v1574_v42, %v2766_v8 }
 0x218   : > { %1898 = vrot.lane.b32.xlu0 %v1805_v26, %s2316_s30  ;;  %v1811_v49 = vsel %vm294_vm0, %v1810_v39, %v1773_v35  ;;  %v1812_v50 = vrot.slane %v1773_v35, 4 }
 0x21a   : > { %v1813_v59 = vsel %vm294_vm0, %v1797_v63, %v1812_v50  ;;  %vm1979_vm0 = vcmask 523264  }
 0x21b   : > { %1914 = vrot.lane.b32.xlu2 %v1809_v48, %s2317_s2 }
 0x21c   : > { %1906 = vrot.lane.b32.xlu1 %v1807_v57, %s2315_s29  ;;  %s2237_s29 = scalar_lea.hbm %s3234_s1, 32 }
 0x21d   : > { %p2239_p8 = scmp.lt.s32.totalorder %s2237_s29, %s2233_s26 }
 0x21f   : > { %p2240_p10 = por %p2239_p8, %p2238_p7 }
 0x220   : > { %1912 = vrot.lane.b32.xlu0 %v1697_v58, %s2317_s2 }
 0x221   : > { %v1817_v37 = vpop.permute.xlu2 %1816  ;;  %p2241_p13 = pnand %p2240_p10, %p2236_p6 }
 0x222   : > { %v1935_v36 = vsel %vm1934_vm1, %v1463_v11, %v1817_v37 }
 0x223   : > { %1928 = vrot.lane.b32.xlu2 %v1701_v20, %s2318_s3 }
 0x224   : > { %1920 = vrot.lane.b32.xlu1 %v1699_v31, %s2319_s4 }
 0x228   : > { %1922 = vrot.lane.b32.xlu0 %v1811_v49, %s2319_s4 }
 0x22c   : > { %1930 = vrot.lane.b32.xlu1 %v1813_v59, %s2318_s3 }
 0x22f   : > { %v1827_v5 = vpop.permute.xlu2 %1826 }
 0x237   : > { %v1835_v44 = vpop.permute.xlu2 %1834 }
 0x239   : > { %v1825_v15 = vpop.permute.xlu1 %1824 }
 0x23a   : > { %v1938_v54 = vsel %vm1937_vm2, %v1935_v36, %v1825_v15 }
 0x241   : > { %v1833_v25 = vpop.permute.xlu1 %1832 }
 0x242   : > { %v1941_v47 = vsel %vm1940_vm3, %v1938_v54, %v1833_v25 }
 0x244   : > { %v1843_v29 = vpop.permute.xlu2 %1842 }
 0x247   : > { %v1819_v23 = vpop.permute.xlu0 %1818 }
 0x248   : > { %v1936_v30 = vsel %vm1934_vm1, %v1575_v52, %v1819_v23 }
 0x249   : > { %v1939_v51 = vsel %vm1937_vm2, %v1936_v30, %v1827_v5 }
 0x24a   : > { %v1942_v43 = vsel %vm1940_vm3, %v1939_v51, %v1835_v44 }
 0x24b   : > { %v1945_v18 = vsel %vm1943_vm4, %v1942_v43, %v1843_v29 }
 0x24c   : > { %v1857_v22 = vpop.permute.xlu2 %1856 }
 0x254   : > { %v1867_v41 = vpop.permute.xlu2 %1866 }
 0x256   : > { %v1841_v2 = vpop.permute.xlu1 %1840 }
 0x257   : > { %v1944_v62 = vsel %vm1943_vm4, %v1941_v47, %v1841_v2 }
 0x259   : > { %v1851_v16 = vpop.permute.xlu0 %1850 }
 0x25a   : > { %v1948_v4 = vsel %vm1946_vm5, %v1945_v18, %v1851_v16 }
 0x25d   : > { %v1881_v1 = vpop.permute.xlu2 %1880 }
 0x25e   : > { %v1849_v24 = vpop.permute.xlu1 %1848 }
 0x25f   : > { %v1947_v61 = vsel %vm1946_vm5, %v1944_v62, %v1849_v24 }
 0x260   : > { %v1950_v6 = vsel %vm1949_vm6, %v1947_v61, %v1857_v22 }
 0x262   : > { %v1865_v56 = vpop.permute.xlu0 %1864 }
 0x263   : > { %v1953_v13 = vsel %vm1952_vm7, %v1950_v6, %v1865_v56 }
 0x265   : > { %v1891_v21 = vpop.permute.xlu2 %1890 }
 0x267   : > { %v1859_v12 = vpop.permute.xlu1 %1858 }
 0x268   : > { %v1951_v28 = vsel %vm1949_vm6, %v1948_v4, %v1859_v12 }
 0x269   : > { %v1954_v19 = vsel %vm1952_vm7, %v1951_v28, %v1867_v41 }
 0x26d   : > { %v1905_v34 = vpop.permute.xlu2 %1904 }
 0x275   : > { %v1915_v38 = vpop.permute.xlu2 %1914 }
 0x276   : > { %v1873_v46 = vpop.permute.xlu1 %1872 }
 0x277   : > { %v1956_v53 = vsel %vm1955_vm8, %v1953_v13, %v1873_v46 }
 0x278   : > { %v1959_v55 = vsel %vm1958_vm9, %v1956_v53, %v1881_v1 }
 0x27a   : > { %v1875_v27 = vpop.permute.xlu0 %1874 }
 0x27b   : > { %v1957_v48 = vsel %vm1955_vm8, %v1954_v19, %v1875_v27 }
 0x27d   : > { %v1929_v9 = vpop.permute.xlu2 %1928 }
 0x27e   : > { %v1883_v8 = vpop.permute.xlu1 %1882 }
 0x27f   : > { %v1960_v3 = vsel %vm1958_vm9, %v1957_v48, %v1883_v8 }
 0x280   : > { %v1963_v45 = vsel %vm1961_vm10, %v1960_v3, %v1891_v21 }
 0x282   : > { %v1889_v33 = vpop.permute.xlu0 %1888 }
 0x283   : > { %v1962_v7 = vsel %vm1961_vm10, %v1959_v55, %v1889_v33 }
 0x286   : > { %v1897_v17 = vpop.permute.xlu1 %1896 }
 0x287   : > { %v1965_v57 = vsel %vm1964_vm11, %v1962_v7, %v1897_v17 }
 0x288   : > { %v1968_v60 = vsel %vm1967_vm12, %v1965_v57, %v1905_v34 }
 0x28a   : > { %v1899_v26 = vpop.permute.xlu0 %1898 }
 0x28b   : > { %v1966_v0 = vsel %vm1964_vm11, %v1963_v45, %v1899_v26 }
 0x28e   : > { %v1907_v40 = vpop.permute.xlu1 %1906 }
 0x28f   : > { %v1969_v14 = vsel %vm1967_vm12, %v1966_v0, %v1907_v40 }
 0x290   : > { %v1972_v20 = vsel %vm1970_vm13, %v1969_v14, %v1915_v38 }
 0x292   : > { %v1913_v10 = vpop.permute.xlu0 %1912 }
 0x293   : > { %v1971_v32 = vsel %vm1970_vm13, %v1968_v60, %v1913_v10 }
 0x296   : > { %v1921_v58 = vpop.permute.xlu1 %1920 }
 0x297   : > { %v1974_v63 = vsel %vm1973_vm14, %v1971_v32, %v1921_v58 }
 0x298   : > { %v1977_v37 = vsel %vm1976_vm15, %v1974_v63, %v1929_v9 }
 0x299   : > { %1980 = vst.msk [vmem:[%s154_s22] sm:$0xff] %vm1979_vm0, %v1977_v37 }
 0x29a   : > { %v1923_v11 = vpop.permute.xlu0 %1922 }
 0x29b   : > { %v1975_v36 = vsel %vm1973_vm14, %v1972_v20, %v1923_v11 }
 0x29e   : > { %v1931_v31 = vpop.permute.xlu1 %1930 }
 0x29f   : > { %v1978_v35 = vsel %vm1976_vm15, %v1975_v36, %v1931_v31 }
 0x2a0   : > { %1981 = vst.msk [vmem:[%s154_s22 + $0x8] sm:$0xff] %vm1979_vm0, %v1978_v35 }
 0x2a1   : > { %2244 = shalt.err (!%p2241_p13)
}
 0x2a2   : > { %s2320_s5 = smov 128  }
 0x2a3   : > { %2106 = dma.vmem_to_hbm [thread:$0]  (%p2382_p9), %s1998_s23, 256, %s2000_s9, %s1983_s24, %s2320_s5, %s2320_s5, %s2305_s16  }
 0x2a4 PF: > { %s2014_s3 = sand.u32 1, %s2279_s6   ;;  %p2113_p0 = pnand %p2090_p12, %p2389_p11 }
 0x2a5   : > { %s2015_s4 = scalar_lea.sflag [#allocation4], %s2014_s3 }
 0x2a6   : > { %p2114_p1 = pneg %p2113_p0 }
 0x2a8   : > { %2274 = dma.done.wait (%p2114_p1), %s2015_s4, 256  }
 0x2a9   : > { %2276 = vsyncadd (%p2114_p1), %s2015_s4, 4294967040  ;;  %s17_s11 = sadd.s32 1, %s2299_s11   ;;  %s3239_s6 = smov %s2283_s7 }
 0x2aa   : > { %p14_p2 = scmp.ge.s32.totalorder %s17_s11, 4   ;;  %s3240_s7 = smov %s2287_s8 }
 0x2ab   : > { %s3241_s8 = smov %s2387_s20  ;;  %s3242_s9 = smov %s2295_s10 }
 0x2ac   : > { %s3243_s10 = smov %s3245_s14  ;;  %16 = sbr.rel (!%p14_p2) target bundleno = 6 (0x6), region = 69 }
 0x2b1   :  { %2021 = vsyncpa [#allocation3], 1 }
 0x2b2   :  { %2023 = vsyncpa [#allocation3 + $0x1], 1 }
 0x2b3   :  { %2024 = vsyncpa [#allocation4], 1 }
 0x2b4   :  { %2026 = vsyncpa [#allocation4 + $0x1], 1 }

</bundles_post_ra>
